<compile_context>
chip_gen: v7x
topology: tpu7x:2x2x1
jax: 0.10.0
libtpu: 0.0.40
codegen_flags: <defaults>
</compile_context>

<pallas_src>
import jax
import jax.numpy as jnp
from jax.experimental import pallas as pl
from jax.experimental.pallas import tpu as pltpu

N = 16
INPUT_DIM = N * N          # 256
HIDDEN_DIM = 100
HIDDEN_PAD = 128           # hidden_dim zero-padded to the 128-lane width
Z_DIM = 2


def _round_up(a, m):
    return ((a + m - 1) // m) * m


# ----------------------------------------------------------------------------- kernel
def vae_fc_kernel(x_ref, eps_ref, wenc_ref, whead_ref, w4_ref, bias_ref,
                  recon_ref, mulogvar_ref):
    """x_ref: (TB, 256); eps_ref: (2, TB) lane-dense.
    wenc_ref: (258, 128) = [w1 ; w3]; whead_ref: (128, 4) = [w21 | w22];
    w4_ref: (128, 256); bias_ref: (4, 256) f32 = [b1 | b3 | bh | b4] (zero-padded).
    recon_ref: (TB, 256); mulogvar_ref: (4, TB) lane-dense (transposed)."""
    cdt = wenc_ref.dtype                     # MXU operand dtype (bf16 or f32)

    b1 = bias_ref[0:1, :HIDDEN_PAD]          # (1, 128) f32
    b3 = bias_ref[1:2, :HIDDEN_PAD]          # (1, 128) f32
    bh = bias_ref[2:3, :2 * Z_DIM]           # (1, 4)   f32
    b4 = bias_ref[3:4, :]                    # (1, 256) f32

    x = x_ref[...]                           # (TB, 256)

    # ---- encode: h1 = relu(fc1(x)) ----
    w1 = wenc_ref[:INPUT_DIM, :]             # (256, 128)
    h1 = jnp.dot(x.astype(cdt), w1, preferred_element_type=jnp.float32) + b1
    h1 = jnp.maximum(h1, 0.0)                # (TB, 128), cols 100..127 == 0

    # ---- fused mu / logvar heads ----
    ml = jnp.dot(h1.astype(cdt), whead_ref[...],
                 preferred_element_type=jnp.float32) + bh        # (TB, 4)
    # Lane-dense store: transpose on the (idle) XLU -> (4, TB).
    mulogvar_ref[...] = jnp.transpose(ml).astype(mulogvar_ref.dtype)

    mu = ml[:, :Z_DIM]                       # (TB, 2)
    logvar = ml[:, Z_DIM:]                   # (TB, 2)

    # ---- reparameterize: z = eps * exp(0.5*logvar) + mu ----
    std = jnp.exp(0.5 * logvar)
    eps = jnp.transpose(eps_ref[...])        # (2, TB) -> (TB, 2), XLU
    z = eps * std + mu                       # (TB, 2)

    # ---- decode ----
    # fc3 has K = z_dim = 2: two broadcast FMAs on the VPU instead of a
    # 128-padded MXU matmul.
    h3 = b3                                  # (1, 128) broadcasts to (TB, 128)
    for d in range(Z_DIM):                   # static unroll
        w3_row = wenc_ref[INPUT_DIM + d:INPUT_DIM + d + 1, :].astype(jnp.float32)
        h3 = h3 + z[:, d:d + 1] * w3_row
    h3 = jnp.maximum(h3, 0.0)                # (TB, 128), cols 100..127 == 0

    recon = jnp.tanh(
        jnp.dot(h3.astype(cdt), w4_ref[...],
                preferred_element_type=jnp.float32) + b4)        # (TB, 256)
    recon_ref[...] = recon.astype(recon_ref.dtype)


# ----------------------------------------------------------------------------- params
def init_linear(key, fan_in, fan_out):
    """PyTorch nn.Linear default init U(-1/sqrt(fan_in), 1/sqrt(fan_in)).
    Returns W as (in, out) and b as (out,)."""
    kw, kb = jax.random.split(key)
    bound = 1.0 / jnp.sqrt(float(fan_in))
    w = jax.random.uniform(kw, (fan_in, fan_out), jnp.float32, -bound, bound)
    b = jax.random.uniform(kb, (fan_out,), jnp.float32, -bound, bound)
    return w, b


def init_params(key):
    k1, k21, k22, k3, k4 = jax.random.split(key, 5)
    return (init_linear(k1, INPUT_DIM, HIDDEN_DIM),     # fc1
            init_linear(k21, HIDDEN_DIM, Z_DIM),        # fc21
            init_linear(k22, HIDDEN_DIM, Z_DIM),        # fc22
            init_linear(k3, Z_DIM, HIDDEN_DIM),         # fc3
            init_linear(k4, HIDDEN_DIM, INPUT_DIM))     # fc4


def pack_params(params, matmul_dtype=jnp.bfloat16):
    """Pad hidden 100->128, fuse mu/logvar heads, collapse 8 arrays into 4.
    matmul_dtype (default bf16) applies to the MXU weight bundles only; the
    bias bundle stays f32."""
    (w1, b1), (w21, b21), (w22, b22), (w3, b3), (w4, b4) = params
    hd, hp = HIDDEN_DIM, HIDDEN_PAD

    # [w1 ; w3] -> (258, 128)
    wenc = jnp.zeros((INPUT_DIM + Z_DIM, hp), jnp.float32)
    wenc = wenc.at[:INPUT_DIM, :hd].set(w1)
    wenc = wenc.at[INPUT_DIM:, :hd].set(w3)

    # fused [w21 | w22] -> (128, 4)
    whead = (jnp.zeros((hp, 2 * Z_DIM), jnp.float32)
             .at[:hd, :Z_DIM].set(w21)
             .at[:hd, Z_DIM:].set(w22))

    # w4 -> (128, 256)
    w4p = jnp.zeros((hp, INPUT_DIM), jnp.float32).at[:hd, :].set(w4)

    # biases -> (4, 256) f32: [b1 | b3 | (b21,b22) | b4], zero padded
    biases = jnp.zeros((4, INPUT_DIM), jnp.float32)
    biases = biases.at[0, :hd].set(b1)
    biases = biases.at[1, :hd].set(b3)
    biases = biases.at[2, :2 * Z_DIM].set(jnp.concatenate([b21, b22]))
    biases = biases.at[3, :].set(b4)

    cast = lambda a: a.astype(matmul_dtype)
    return (cast(wenc), cast(whead), cast(w4p), biases)


# ----------------------------------------------------------------------------- forward
def vae_fc_forward(x, eps, packed_params, *, max_batch_tile=2048,
                   recon_dtype=jnp.bfloat16):
    """x: (B, 1, N, N) or (B, N*N), f32 or bf16 (streamed as given);
    eps: (B, z_dim) f32.  Returns (recon (B, N*N) recon_dtype, mu, logvar f32)."""
    B = x.shape[0]
    x_flat = x.reshape(B, INPUT_DIM)
    if x_flat.dtype not in (jnp.float32, jnp.bfloat16):
        x_flat = x_flat.astype(jnp.float32)
    # Lane-dense eps stream: (z_dim, B).  A caller that produces eps directly in
    # this orientation avoids this (tiny) wrapper transpose.
    eps_t = jnp.transpose(eps.astype(jnp.float32))           # (2, B)

    # --- batch tile / grid selection ---
    # Transposed (2, TB) / (4, TB) blocks require TB to be a multiple of 128
    # unless the grid has a single step (TB == Bp).  For B > 128 we force at
    # least 2 grid steps so both v7x TensorCores get work.
    B8 = _round_up(B, 8)
    if B8 <= 128:
        TB = B8
        Bp = B8
    else:
        cap = _round_up(max(max_batch_tile, 128), 128)
        TB = min(cap, _round_up(pl.cdiv(B8, 2), 128))
        Bp = _round_up(B, TB)
    grid = (Bp // TB,)

    if Bp != B:
        x_flat = jnp.pad(x_flat, ((0, Bp - B), (0, 0)))
        eps_t = jnp.pad(eps_t, ((0, 0), (0, Bp - B)))

    wenc, whead, w4p, biases = packed_params

    # Advisory cost estimate for XLA's scheduler.
    flops = 2 * Bp * (INPUT_DIM * HIDDEN_PAD + HIDDEN_PAD * 2 * Z_DIM
                      + Z_DIM * HIDDEN_PAD + HIDDEN_PAD * INPUT_DIM)
    transcendentals = Bp * (Z_DIM + INPUT_DIM)                # exp + tanh
    param_bytes = sum(int(p.size) * p.dtype.itemsize for p in packed_params)
    bytes_accessed = (Bp * INPUT_DIM * x_flat.dtype.itemsize          # x
                      + Bp * INPUT_DIM * jnp.dtype(recon_dtype).itemsize  # recon
                      + Bp * Z_DIM * 4 + Bp * 2 * Z_DIM * 4            # eps + mu/logvar
                      + param_bytes)
    cost = pl.CostEstimate(flops=int(flops), transcendentals=int(transcendentals),
                           bytes_accessed=int(bytes_accessed))

    x_spec = pl.BlockSpec((TB, INPUT_DIM), lambda i: (i, 0))
    eps_spec = pl.BlockSpec((Z_DIM, TB), lambda i: (0, i))
    param_specs = [pl.BlockSpec(p.shape, lambda i: (0, 0)) for p in packed_params]
    recon_spec = pl.BlockSpec((TB, INPUT_DIM), lambda i: (i, 0))
    ml_spec = pl.BlockSpec((2 * Z_DIM, TB), lambda i: (0, i))

    recon, ml_t = pl.pallas_call(
        vae_fc_kernel,
        out_shape=(
            jax.ShapeDtypeStruct((Bp, INPUT_DIM), recon_dtype),
            jax.ShapeDtypeStruct((2 * Z_DIM, Bp), jnp.float32),
        ),
        grid=grid,
        in_specs=[x_spec, eps_spec] + param_specs,
        out_specs=(recon_spec, ml_spec),
        compiler_params=pltpu.CompilerParams(
            dimension_semantics=("parallel",),
            vmem_limit_bytes=48 * 1024 * 1024),
        cost_estimate=cost,
    )(x_flat, eps_t, wenc, whead, w4p, biases)

    recon = recon[:B]
    mu = jnp.transpose(ml_t[:Z_DIM, :B])           # (B, 2)
    logvar = jnp.transpose(ml_t[Z_DIM:, :B])       # (B, 2)
    return recon, mu, logvar


# ----------------------------------------------------------------------------- test
if __name__ == "__main__":
    key = jax.random.PRNGKey(0)
    k_x, k_eps, k_param, k_x2, k_eps2 = jax.random.split(key, 5)

    params = init_params(k_param)

    def reference(xf, eps, params):
        (w1, b1), (w21, b21), (w22, b22), (w3, b3), (w4, b4) = params
        hi = jax.lax.Precision.HIGHEST
        h1 = jnp.maximum(jnp.dot(xf, w1, precision=hi) + b1, 0.0)
        mu = jnp.dot(h1, w21, precision=hi) + b21
        lv = jnp.dot(h1, w22, precision=hi) + b22
        z = eps * jnp.exp(0.5 * lv) + mu
        h3 = jnp.maximum(jnp.dot(z, w3, precision=hi) + b3, 0.0)
        rec = jnp.tanh(jnp.dot(h3, w4, precision=hi) + b4)
        return rec, mu, lv

    # --- small batch, optimized defaults (bf16 MXU operands, bf16 recon) ---
    B = 2
    x = jax.random.normal(k_x, (B, 1, N, N), dtype=jnp.float32)     # NCHW input
    eps = jax.random.normal(k_eps, (B, Z_DIM), dtype=jnp.float32)   # randn_like(std)
    packed_bf16 = pack_params(params)                               # default bf16
    recon, mu, logvar = vae_fc_forward(x, eps, packed_bf16)
    jax.block_until_ready((recon, mu, logvar))

    rec_r, mu_r, lv_r = reference(x.reshape(B, INPUT_DIM), eps, params)
    assert recon.shape == (B, INPUT_DIM)
    assert mu.shape == (B, Z_DIM) and logvar.shape == (B, Z_DIM)
    assert recon.dtype == jnp.bfloat16
    assert bool(jnp.all(jnp.isfinite(recon.astype(jnp.float32))))
    assert bool(jnp.all(jnp.abs(recon.astype(jnp.float32)) <= 1.0))
    assert bool(jnp.allclose(mu, mu_r, atol=4e-2, rtol=4e-2))
    assert bool(jnp.allclose(logvar, lv_r, atol=4e-2, rtol=4e-2))
    assert bool(jnp.allclose(recon.astype(jnp.float32), rec_r, atol=4e-2, rtol=4e-2))

    # --- full-precision config vs reference (tighter tolerance) ---
    packed_f32 = pack_params(params, matmul_dtype=jnp.float32)
    recon32, mu32, lv32 = vae_fc_forward(x, eps, packed_f32, recon_dtype=jnp.float32)
    jax.block_until_ready((recon32, mu32, lv32))
    assert bool(jnp.allclose(mu32, mu_r, atol=1e-2, rtol=1e-2))
    assert bool(jnp.allclose(lv32, lv_r, atol=1e-2, rtol=1e-2))
    assert bool(jnp.allclose(recon32, rec_r, atol=1e-2, rtol=1e-2))

    # --- multi-step grid path (>= 2 grid steps, batch padding, 128-wide tiles) ---
    B2 = 200
    x2 = jax.random.normal(k_x2, (B2, INPUT_DIM), dtype=jnp.float32)
    eps2 = jax.random.normal(k_eps2, (B2, Z_DIM), dtype=jnp.float32)
    recon2, mu2, lv2 = vae_fc_forward(x2, eps2, packed_bf16, max_batch_tile=128)
    jax.block_until_ready((recon2, mu2, lv2))
    rec2_r, mu2_r, lv2_r = reference(x2, eps2, params)
    assert recon2.shape == (B2, INPUT_DIM) and mu2.shape == (B2, Z_DIM)
    assert bool(jnp.allclose(mu2, mu2_r, atol=4e-2, rtol=4e-2))
    assert bool(jnp.allclose(lv2, lv2_r, atol=4e-2, rtol=4e-2))
    assert bool(jnp.allclose(recon2.astype(jnp.float32), rec2_r, atol=4e-2, rtol=4e-2))

    print("KERNEL_OK")
</pallas_src>

<mosaic_0001>
module attributes {stable_mosaic.version = 11 : i64} {
  func.func @vae_fc_kernel(%arg0: i32, %arg1: memref<8x256xf32, #tpu.memory_space<vmem>>, %arg2: memref<2x8xf32, #tpu.memory_space<vmem>>, %arg3: memref<258x128xbf16, #tpu.memory_space<vmem>>, %arg4: memref<128x4xbf16, #tpu.memory_space<vmem>>, %arg5: memref<128x256xbf16, #tpu.memory_space<vmem>>, %arg6: memref<4x256xf32, #tpu.memory_space<vmem>>, %arg7: memref<8x256xbf16, #tpu.memory_space<vmem>>, %arg8: memref<4x8xf32, #tpu.memory_space<vmem>>) attributes {dimension_semantics = [#tpu.dimension_semantics<parallel>], iteration_bounds = array<i64: 1>, scalar_prefetch = 0 : i64, scratch_operands = 0 : i64, tpu.core_type = #tpu.core_type<tc>, window_params = [{transform_indices = @transform_0, window_bounds = array<i64: 8, 256>}, {transform_indices = @transform_1, window_bounds = array<i64: 2, 8>}, {pipeline_mode = #tpu.pipeline_mode<synchronous>, transform_indices = @transform_2, window_bounds = array<i64: 258, 128>}, {pipeline_mode = #tpu.pipeline_mode<synchronous>, transform_indices = @transform_3, window_bounds = array<i64: 128, 4>}, {pipeline_mode = #tpu.pipeline_mode<synchronous>, transform_indices = @transform_4, window_bounds = array<i64: 128, 256>}, {pipeline_mode = #tpu.pipeline_mode<synchronous>, transform_indices = @transform_5, window_bounds = array<i64: 4, 256>}, {transform_indices = @transform_6, window_bounds = array<i64: 8, 256>}, {transform_indices = @transform_7, window_bounds = array<i64: 4, 8>}]} {
    %c0 = arith.constant 0 : index
    %c0_0 = arith.constant 0 : index
    %0 = vector.load %arg6[%c0, %c0_0] : memref<4x256xf32, #tpu.memory_space<vmem>>, vector<1x128xf32>
    %c1 = arith.constant 1 : index
    %c0_1 = arith.constant 0 : index
    %1 = vector.load %arg6[%c1, %c0_1] : memref<4x256xf32, #tpu.memory_space<vmem>>, vector<1x128xf32>
    %c2 = arith.constant 2 : index
    %c0_2 = arith.constant 0 : index
    %2 = vector.load %arg6[%c2, %c0_2] : memref<4x256xf32, #tpu.memory_space<vmem>>, vector<1x4xf32>
    %c3 = arith.constant 3 : index
    %c0_3 = arith.constant 0 : index
    %3 = vector.load %arg6[%c3, %c0_3] : memref<4x256xf32, #tpu.memory_space<vmem>>, vector<1x256xf32>
    %c0_4 = arith.constant 0 : index
    %c0_5 = arith.constant 0 : index
    %4 = vector.load %arg1[%c0_4, %c0_5] : memref<8x256xf32, #tpu.memory_space<vmem>>, vector<8x256xf32>
    %c0_6 = arith.constant 0 : index
    %c0_7 = arith.constant 0 : index
    %5 = vector.load %arg3[%c0_6, %c0_7] : memref<258x128xbf16, #tpu.memory_space<vmem>>, vector<256x128xbf16>
    %6 = arith.truncf %4 : vector<8x256xf32> to vector<8x256xbf16>
    %cst = arith.constant dense<0.000000e+00> : vector<8x128xf32>
    %7 = tpu.matmul %6, %5, %cst {dimension_numbers = #tpu.dot_dimension_numbers<[1], [0], [0], [1], [0, 0, 1, 1], [], []>} : vector<8x256xbf16>, vector<256x128xbf16>, vector<8x128xf32> -> vector<8x128xf32>
    %8 = vector.broadcast %0 : vector<1x128xf32> to vector<8x128xf32>
    %9 = arith.addf %7, %8 : vector<8x128xf32>
    %cst_8 = arith.constant 0.000000e+00 : f32
    %10 = vector.broadcast %cst_8 : f32 to vector<8x128xf32>
    %11 = arith.maximumf %9, %10 : vector<8x128xf32>
    %12 = arith.truncf %11 : vector<8x128xf32> to vector<8x128xbf16>
    %c0_9 = arith.constant 0 : index
    %c0_10 = arith.constant 0 : index
    %13 = vector.load %arg4[%c0_9, %c0_10] : memref<128x4xbf16, #tpu.memory_space<vmem>>, vector<128x4xbf16>
    %cst_11 = arith.constant dense<0.000000e+00> : vector<8x4xf32>
    %14 = tpu.matmul %12, %13, %cst_11 {dimension_numbers = #tpu.dot_dimension_numbers<[1], [0], [0], [1], [0, 0, 1, 1], [], []>} : vector<8x128xbf16>, vector<128x4xbf16>, vector<8x4xf32> -> vector<8x4xf32>
    %15 = vector.broadcast %2 : vector<1x4xf32> to vector<8x4xf32>
    %16 = arith.addf %14, %15 : vector<8x4xf32>
    %17 = tpu.transpose %16, [1, 0] : vector<8x4xf32> -> vector<4x8xf32>
    %c0_12 = arith.constant 0 : index
    %c0_13 = arith.constant 0 : index
    %18 = vector.load %arg8[%c0_12, %c0_13] : memref<4x8xf32, #tpu.memory_space<vmem>>, vector<4x8xf32>
    tpu.vector_store %arg8[%c0_12, %c0_13], %17 {strides = array<i32>} : memref<4x8xf32, #tpu.memory_space<vmem>>, vector<4x8xf32>,
    %19 = vector.extract_strided_slice %16 {offsets = [0, 0], sizes = [8, 2], strides = [1, 1]} : vector<8x4xf32> to vector<8x2xf32>
    %20 = vector.extract_strided_slice %16 {offsets = [0, 2], sizes = [8, 2], strides = [1, 1]} : vector<8x4xf32> to vector<8x2xf32>
    %cst_14 = arith.constant 5.000000e-01 : f32
    %21 = vector.broadcast %cst_14 : f32 to vector<8x2xf32>
    %22 = arith.mulf %21, %20 : vector<8x2xf32>
    %23 = math.exp %22 : vector<8x2xf32>
    %c0_15 = arith.constant 0 : index
    %c0_16 = arith.constant 0 : index
    %24 = vector.load %arg2[%c0_15, %c0_16] : memref<2x8xf32, #tpu.memory_space<vmem>>, vector<2x8xf32>
    %25 = tpu.transpose %24, [1, 0] : vector<2x8xf32> -> vector<8x2xf32>
    %26 = arith.mulf %25, %23 : vector<8x2xf32>
    %27 = arith.addf %26, %19 : vector<8x2xf32>
    %c256 = arith.constant 256 : index
    %c0_17 = arith.constant 0 : index
    %28 = vector.load %arg3[%c256, %c0_17] : memref<258x128xbf16, #tpu.memory_space<vmem>>, vector<1x128xbf16>
    %29 = arith.extf %28 : vector<1x128xbf16> to vector<1x128xf32>
    %30 = vector.extract_strided_slice %27 {offsets = [0, 0], sizes = [8, 1], strides = [1, 1]} : vector<8x2xf32> to vector<8x1xf32>
    %31 = vector.broadcast %30 : vector<8x1xf32> to vector<8x128xf32>
    %32 = vector.broadcast %29 : vector<1x128xf32> to vector<8x128xf32>
    %33 = arith.mulf %31, %32 : vector<8x128xf32>
    %34 = vector.broadcast %1 : vector<1x128xf32> to vector<8x128xf32>
    %35 = arith.addf %34, %33 : vector<8x128xf32>
    %c257 = arith.constant 257 : index
    %c0_18 = arith.constant 0 : index
    %36 = vector.load %arg3[%c257, %c0_18] : memref<258x128xbf16, #tpu.memory_space<vmem>>, vector<1x128xbf16>
    %37 = arith.extf %36 : vector<1x128xbf16> to vector<1x128xf32>
    %38 = vector.extract_strided_slice %27 {offsets = [0, 1], sizes = [8, 1], strides = [1, 1]} : vector<8x2xf32> to vector<8x1xf32>
    %39 = vector.broadcast %38 : vector<8x1xf32> to vector<8x128xf32>
    %40 = vector.broadcast %37 : vector<1x128xf32> to vector<8x128xf32>
    %41 = arith.mulf %39, %40 : vector<8x128xf32>
    %42 = arith.addf %35, %41 : vector<8x128xf32>
    %cst_19 = arith.constant 0.000000e+00 : f32
    %43 = vector.broadcast %cst_19 : f32 to vector<8x128xf32>
    %44 = arith.maximumf %42, %43 : vector<8x128xf32>
    %45 = arith.truncf %44 : vector<8x128xf32> to vector<8x128xbf16>
    %c0_20 = arith.constant 0 : index
    %c0_21 = arith.constant 0 : index
    %46 = vector.load %arg5[%c0_20, %c0_21] : memref<128x256xbf16, #tpu.memory_space<vmem>>, vector<128x256xbf16>
    %cst_22 = arith.constant dense<0.000000e+00> : vector<8x256xf32>
    %47 = tpu.matmul %45, %46, %cst_22 {dimension_numbers = #tpu.dot_dimension_numbers<[1], [0], [0], [1], [0, 0, 1, 1], [], []>} : vector<8x128xbf16>, vector<128x256xbf16>, vector<8x256xf32> -> vector<8x256xf32>
    %48 = vector.broadcast %3 : vector<1x256xf32> to vector<8x256xf32>
    %49 = arith.addf %47, %48 : vector<8x256xf32>
    %50 = math.tanh %49 : vector<8x256xf32>
    %51 = arith.truncf %50 : vector<8x256xf32> to vector<8x256xbf16>
    %c0_23 = arith.constant 0 : index
    %c0_24 = arith.constant 0 : index
    %52 = vector.load %arg7[%c0_23, %c0_24] : memref<8x256xbf16, #tpu.memory_space<vmem>>, vector<8x256xbf16>
    tpu.vector_store %arg7[%c0_23, %c0_24], %51 {strides = array<i32>} : memref<8x256xbf16, #tpu.memory_space<vmem>>, vector<8x256xbf16>,
    return
  }
  func.func @transform_0(%arg0: i32) -> (i32, i32) {
    %c0_i32 = arith.constant 0 : i32
    %c0_i32_0 = arith.constant 0 : i32
    return %arg0, %c0_i32 : i32, i32
  }
  func.func @transform_1(%arg0: i32) -> (i32, i32) {
    %c0_i32 = arith.constant 0 : i32
    %c0_i32_0 = arith.constant 0 : i32
    return %c0_i32, %arg0 : i32, i32
  }
  func.func @transform_2(%arg0: i32) -> (i32, i32) {
    %c0_i32 = arith.constant 0 : i32
    %c0_i32_0 = arith.constant 0 : i32
    %c0_i32_1 = arith.constant 0 : i32
    return %c0_i32, %c0_i32_0 : i32, i32
  }
  func.func @transform_3(%arg0: i32) -> (i32, i32) {
    %c0_i32 = arith.constant 0 : i32
    %c0_i32_0 = arith.constant 0 : i32
    %c0_i32_1 = arith.constant 0 : i32
    return %c0_i32, %c0_i32_0 : i32, i32
  }
  func.func @transform_4(%arg0: i32) -> (i32, i32) {
    %c0_i32 = arith.constant 0 : i32
    %c0_i32_0 = arith.constant 0 : i32
    %c0_i32_1 = arith.constant 0 : i32
    return %c0_i32, %c0_i32_0 : i32, i32
  }
  func.func @transform_5(%arg0: i32) -> (i32, i32) {
    %c0_i32 = arith.constant 0 : i32
    %c0_i32_0 = arith.constant 0 : i32
    %c0_i32_1 = arith.constant 0 : i32
    return %c0_i32, %c0_i32_0 : i32, i32
  }
  func.func @transform_6(%arg0: i32) -> (i32, i32) {
    %c0_i32 = arith.constant 0 : i32
    %c0_i32_0 = arith.constant 0 : i32
    return %arg0, %c0_i32 : i32, i32
  }
  func.func @transform_7(%arg0: i32) -> (i32, i32) {
    %c0_i32 = arith.constant 0 : i32
    %c0_i32_0 = arith.constant 0 : i32
    return %c0_i32, %arg0 : i32, i32
  }
}

</mosaic_0001>

<bundles_post_ra>
// kernel: tpu_custom_call.1
= control target key start
LH: loop header
LB: loop body
LE: loop exit
PB: predicated region body
PF: predicated region fallthrough
CT: control target
= control target key end

     0   :  { %13 = vsyncpa [#allocation3], 0  ;;  %s1059_s0 = inlined_call_operand.vmem [shape: f32[8,256], index: 0, kind: input, shape index: {}]   ;;  %s1060_s1 = inlined_call_operand.vmem [shape: f32[2,8], index: 1, kind: input, shape index: {}]   ;;  %s1061_s2 = inlined_call_operand.hbm [shape: bf16[258,128], index: 2, kind: input, shape index: {}]   ;;  %s1062_s3 = inlined_call_operand.vmem [shape: bf16[128,4], index: 3, kind: input, shape index: {}]   ;;  %s1063_s4 = inlined_call_operand.hbm [shape: bf16[128,256], index: 4, kind: input, shape index: {}]   ;;  %s1064_s5 = inlined_call_operand.vmem [shape: f32[4,256], index: 5, kind: input, shape index: {}]   ;;  %s1065_s6 = inlined_call_operand.hbm [shape: bf16[8,256], index: 6, kind: output, shape index: {0}]   ;;  %s1066_s7 = inlined_call_operand.hbm [shape: f32[4,8], index: 7, kind: output, shape index: {1}]  }
   0x1   :  { %14 = vsyncpa [#allocation6], 0 }
   0x2   :  { %15 = vsyncpa [#allocation4], 0 }
   0x3   :  { %16 = vsyncpa [#allocation9], 0  ;;  %s904_s24 = smov [#allocation2]   ;;  %s808_s28 = scalar_lea.hbm %s1061_s2, 2112 }
   0x4   :  { %s26_s25 = sshll.u32 %s904_s24, 4  ;;  %p809_p0 = scmp.ne.s32.totalorder %s1061_s2, %s808_s28  ;;  %s27_s25 = int_to_ptr.vmem [resolvable:$true] %s26_s25 }
   0x5   :  { %p812_p1 = scmp.lt.u32.totalorder %s808_s28, %s1061_s2 }
   0x7   :  { %p814_p2 = pnand %p812_p1, %p809_p0 }
   0x9   :  { %817 = shalt.err (!%p814_p2)
}
   0xa   :  { %s818_s10 = scalar_lea.vmem %s27_s25, 2112  ;;  %p823_p4 = scmp.lt.s32.totalorder %s27_s25, %s27_s25 }
   0xb   :  { %p819_p3 = scmp.ne.s32.totalorder %s27_s25, %s818_s10  ;;  %p824_p5 = scmp.lt.s32.totalorder %s818_s10, %s818_s10 }
   0xd   :  { %p825_p6 = por %p824_p5, %p823_p4 }
   0xf   :  { %p826_p7 = pnand %p825_p6, %p819_p3 }
  0x11   :  { %829 = shalt.err (!%p826_p7)
}
  0x12   :  { %s905_s11 = smov 64   ;;  %s906_s12 = smov 4  }
  0x13   :  { %32 = dma.hbm_to_vmem [thread:$0]  %s1061_s2, 2112, %s27_s25, [#allocation3], %s905_s11, %s905_s11, %s906_s12  }
  0x14   :  { %s907_s15 = smov [#allocation5]   ;;  %s830_s19 = scalar_lea.hbm %s1063_s4, 2048 }
  0x15   :  { %s40_s16 = sshll.u32 %s907_s15, 4  ;;  %p831_p8 = scmp.ne.s32.totalorder %s1063_s4, %s830_s19  ;;  %s41_s16 = int_to_ptr.vmem [resolvable:$true] %s40_s16 }
  0x16   :  { %p834_p9 = scmp.lt.u32.totalorder %s830_s19, %s1063_s4 }
  0x18   :  { %p836_p10 = pnand %p834_p9, %p831_p8 }
  0x1a   :  { %839 = shalt.err (!%p836_p10)
}
  0x1b   :  { %s840_s24 = scalar_lea.vmem %s41_s16, 2048  ;;  %p845_p12 = scmp.lt.s32.totalorder %s41_s16, %s41_s16 }
  0x1c   :  { %p841_p11 = scmp.ne.s32.totalorder %s41_s16, %s840_s24  ;;  %p846_p13 = scmp.lt.s32.totalorder %s840_s24, %s840_s24 }
  0x1e   :  { %p847_p0 = por %p846_p13, %p845_p12 }
  0x20   :  { %p848_p1 = pnand %p847_p0, %p841_p11 }
  0x22   :  { %851 = shalt.err (!%p848_p1)
}
  0x23   :  { %s908_s2 = smov 128   ;;  %s909_s25 = smov 8  }
  0x24   :  { %46 = dma.hbm_to_vmem [thread:$0]  %s1063_s4, 2048, %s41_s16, [#allocation6], %s908_s2, %s908_s2, %s909_s25  }
  0x25   :  { %896 = dma.done.wait [#allocation3], 2112  }
  0x26   :  { %897 = vsyncadd [#allocation3], 4294965184 }
  0x27   :  { %898 = dma.done.wait [#allocation6], 2048  }
  0x28   :  { %899 = vsyncadd [#allocation6], 4294965248  ;;  %v910_v0 = vmov 0.0   ;;  %v754_v1 = vld [vmem:[#allocation2 + $0x40] sm:$0xff]   ;;  %v756_v3 = vld [vmem:[#allocation2 + $0x48] sm:$0xff]   ;;  %vm911_vm0 = vmmov 0  }
  0x29   :  { %718 = vmatprep.subr.bf16.mxu1 %v910_v0  ;;  %v755_v2 = vld [vmem:[#allocation2] sm:$0xff]   ;;  %687 = vmatprep.subr.bf16.mxu0 %v754_v1  ;;  %v757_v4 = vld [vmem:[#allocation2 + $0x8] sm:$0xff]   ;;  %v758_v5 = vld [vmem:[#allocation2 + $0x50] sm:$0xff]   ;;  %v913_v48 = vmov 0   ;;  %v914_v49 = vmov 1   ;;  %vm379_vm1 = vcmask 60416  }
  0x2a   :  { %688 = vmatpush3.bf16.msra.mxu0 %v755_v2  ;;  %v759_v6 = vld [vmem:[#allocation2 + $0x10] sm:$0xff]   ;;  %v760_v7 = vld [vmem:[#allocation2 + $0x58] sm:$0xff]   ;;  %v762_v9 = vld [vmem:[#allocation2 + $0x60] sm:$0xff]   ;;  %734 = vmatprep.mubr.msk.bf16.mxu1 %vm911_vm0, %v910_v0  ;;  %s915_s28 = smov [#allocation8]  }
  0x2b   :  { %689 = vmatprep.subr.bf16.mxu0 %v756_v3  ;;  %v761_v8 = vld [vmem:[#allocation2 + $0x18] sm:$0xff]   ;;  %v763_v10 = vld [vmem:[#allocation2 + $0x20] sm:$0xff]   ;;  %v764_v11 = vld [vmem:[#allocation2 + $0x68] sm:$0xff]   ;;  %751 = vset.pattern.permute.xlu1 %v913_v48  ;;  %s627_s29 = sshll.u32 %s915_s28, 4  ;;  %s628_s29 = int_to_ptr.vmem [resolvable:$true] %s627_s29 }
  0x2c   :  { %v62_v12 = vld [vmem:[%s1059_s0 + $0x8] sm:$0xff]  ;;  %v770_v14 = vld [vmem:[%s1062_s3] sm:$0xff]   ;;  %v766_v16 = vld [vmem:[#allocation2 + $0x70] sm:$0xff]   ;;  %s852_s30 = scalar_lea.vmem %s628_s29, 64  ;;  %p857_p3 = scmp.lt.s32.totalorder %s628_s29, %s628_s29 }
  0x2d   :  { %v96_v13 = vpack.c.bf16 %v62_v12, %v62_v12  ;;  %v765_v15 = vld [vmem:[#allocation2 + $0x28] sm:$0xff]   ;;  %719 = vmatpush3.bf16.msra.mxu1 %v770_v14  ;;  %v767_v18 = vld [vmem:[#allocation2 + $0x30] sm:$0xff]   ;;  %v768_v19 = vld [vmem:[#allocation2 + $0x78] sm:$0xff]   ;;  %p853_p2 = scmp.ne.s32.totalorder %s628_s29, %s852_s30  ;;  %p858_p4 = scmp.lt.s32.totalorder %s852_s30, %s852_s30 }
  0x2e   :  { %690 = vmatpush3.bf16.msra.mxu0 %v757_v4  ;;  %v771_v17 = vld [vmem:[%s1062_s3 + $0x8] sm:$0xff]   ;;  %720 = vmatprep.subr.bf16.mxu1 %v910_v0  ;;  %v772_v20 = vld [vmem:[%s1062_s3 + $0x10] sm:$0xff]   ;;  %v769_v21 = vld [vmem:[#allocation2 + $0x38] sm:$0xff]  }
  0x2f   :  { %691 = vmatprep.subr.bf16.mxu0 %v758_v5  ;;  %229 = vmatprep.mubr.bf16.mxu0 %v96_v13  ;;  %v61_v22 = vld [vmem:[%s1059_s0] sm:$0xff]  ;;  %v773_v23 = vld [vmem:[%s1062_s3 + $0x18] sm:$0xff]   ;;  %v775_v26 = vld [vmem:[%s1062_s3 + $0x28] sm:$0xff]   ;;  %p859_p5 = por %p858_p4, %p857_p3 }
  0x30   :  { %v95_v24 = vpack.c.bf16 %v61_v22, %v61_v22  ;;  %v774_v25 = vld [vmem:[%s1062_s3 + $0x20] sm:$0xff]   ;;  %v776_v27 = vld [vmem:[%s1062_s3 + $0x30] sm:$0xff]   ;;  %v777_v28 = vld [vmem:[%s1062_s3 + $0x38] sm:$0xff]   ;;  %s912_s3 = smov 126  }
  0x31   :  { %721 = vmatpush3.bf16.msra.mxu1 %v771_v17  ;;  %v642_v30 = vld [vmem:[%s1064_s5] ss:$0 sm:$0xff]  ;;  %v659_v38 = vld [vmem:[%s1064_s5 + $0x2] ss:$0 sm:$0xff]  ;;  %v778_v50 = vld [vmem:[#allocation5] ss:$8 sps:$4 sm:$0xff]   ;;  %p860_p6 = pnand %p859_p5, %p853_p2 }
  0x32   :  { %692 = vmatpush3.bf16.msra.mxu0 %v759_v6  ;;  %722 = vmatprep.subr.bf16.mxu1 %v910_v0  ;;  %v384_v47 = vld [vmem:[%s1060_s1] sm:$0x3]  ;;  %v780_v51 = vld [vmem:[#allocation5 + $0x4] ss:$8 sps:$4 sm:$0xff]   ;;  %v781_v53 = vld [vmem:[#allocation5 + $0x10] ss:$8 sps:$4 sm:$0xff]   ;;  %v430_v6 = vlaneseq }
  0x33   :  { %693 = vmatprep.subr.bf16.mxu0 %v760_v7  ;;  %v783_v52 = vld [vmem:[#allocation5 + $0x14] ss:$8 sps:$4 sm:$0xff]   ;;  %v786_v54 = vld [vmem:[#allocation5 + $0x24] ss:$8 sps:$4 sm:$0xff]   ;;  %v784_v55 = vld [vmem:[#allocation5 + $0x20] ss:$8 sps:$4 sm:$0xff]  }
  0x34   :  { %v789_v56 = vld [vmem:[#allocation5 + $0x34] ss:$8 sps:$4 sm:$0xff]   ;;  %v787_v57 = vld [vmem:[#allocation5 + $0x30] ss:$8 sps:$4 sm:$0xff]   ;;  %v792_v58 = vld [vmem:[#allocation5 + $0x44] ss:$8 sps:$4 sm:$0xff]  }
  0x35   :  { %723 = vmatpush3.bf16.msra.mxu1 %v772_v20  ;;  %v790_v59 = vld [vmem:[#allocation5 + $0x40] ss:$8 sps:$4 sm:$0xff]   ;;  %v793_v1 = vld [vmem:[#allocation5 + $0x50] ss:$8 sps:$4 sm:$0xff]   ;;  %v798_v2 = vld [vmem:[#allocation5 + $0x64] ss:$8 sps:$4 sm:$0xff]  }
  0x36   :  { %694 = vmatpush3.bf16.msra.mxu0 %v761_v8  ;;  %724 = vmatprep.subr.bf16.mxu1 %v910_v0  ;;  %v796_v3 = vld [vmem:[#allocation5 + $0x60] ss:$8 sps:$4 sm:$0xff]   ;;  %v801_v4 = vld [vmem:[#allocation5 + $0x74] ss:$8 sps:$4 sm:$0xff]   ;;  %v799_v5 = vld [vmem:[#allocation5 + $0x70] ss:$8 sps:$4 sm:$0xff]  }
  0x37   :  { %695 = vmatprep.subr.bf16.mxu0 %v762_v9  ;;  %v431_v7 = vshrl.u32 %v430_v6, 7  ;;  %v423_v8 = vld [vmem:[#allocation2 + $0x80] sm:$0x1] }
  0x38   :  { %v424_v9 = vunpack.c.l.bf16 %v423_v8 }
  0x39   :  { %725 = vmatpush3.bf16.msra.mxu1 %v773_v23  ;;  %v446_v12 = vsub.s32 1, %v431_v7 }
  0x3a   :  { %696 = vmatpush3.bf16.msra.mxu0 %v763_v10  ;;  %726 = vmatprep.subr.bf16.mxu1 %v910_v0  ;;  %v432_v10 = vsub.s32 0, %v431_v7 }
  0x3b   :  { %697 = vmatprep.subr.bf16.mxu0 %v764_v11 }
  0x3c   :  { %v433_v11 = vrot.slane %v424_v9, %v432_v10 }
  0x3d   :  { %727 = vmatpush3.bf16.msra.mxu1 %v774_v25 }
  0x3e   :  { %698 = vmatpush3.bf16.msra.mxu0 %v765_v15  ;;  %728 = vmatprep.subr.bf16.mxu1 %v910_v0  ;;  %v447_v15 = vrot.slane %v424_v9, %v446_v12 }
  0x3f   :  { %699 = vmatprep.subr.bf16.mxu0 %v766_v16  ;;  %v668_v16 = vld [vmem:[%s1064_s5 + $0x1] ss:$0 sm:$0xff] }
  0x41   :  { %729 = vmatpush3.bf16.msra.mxu1 %v775_v26 }
  0x42   :  { %700 = vmatpush3.bf16.msra.mxu0 %v767_v18  ;;  %730 = vmatprep.subr.bf16.mxu1 %v910_v0 }
  0x43   :  { %701 = vmatprep.subr.bf16.mxu0 %v768_v19 }
  0x45   :  { %731 = vmatpush3.bf16.msra.mxu1 %v776_v27 }
  0x46   :  { %702 = vmatpush3.bf16.msra.mxu0 %v769_v21  ;;  %732 = vmatprep.subr.bf16.mxu1 %v910_v0  ;;  %v795_v0 = vld [vmem:[#allocation5 + $0x54] ss:$8 sps:$4 sm:$0xff]  }
  0x47   :  { %559 = vmatprep.subr.bf16.mxu0 %v780_v51 }
  0x49   :  { %230 = vmatmul.mubr.bf16.vlgmr.msra.gmra.mrb[0].mxu0 %v95_v24  ;;  %733 = vmatpush3.bf16.msra.mxu1 %v777_v28 }
  0x4a   :  { %591 = vmatprep.mubr.bf16.mxu0 %v913_v48  ;;  %560 = vmatpush1.bf16.msra.mxu0 %v778_v50 }
  0x4b   :  { %561 = vmatprep.subr.bf16.mxu0 %v783_v52 }
  0x4e   :  { %562 = vmatpush1.bf16.msra.mxu0 %v781_v53 }
  0x4f   :  { %563 = vmatprep.subr.bf16.mxu0 %v786_v54 }
  0x52   :  { %564 = vmatpush1.bf16.msra.mxu0 %v784_v55 }
  0x53   :  { %565 = vmatprep.subr.bf16.mxu0 %v789_v56 }
  0x56   :  { %566 = vmatpush1.bf16.msra.mxu0 %v787_v57 }
  0x57   :  { %567 = vmatprep.subr.bf16.mxu0 %v792_v58 }
  0x5a   :  { %568 = vmatpush1.bf16.msra.mxu0 %v790_v59 }
  0x5b   :  { %569 = vmatprep.subr.bf16.mxu0 %v795_v0 }
  0x5e   :  { %570 = vmatpush1.bf16.msra.mxu0 %v793_v1 }
  0x5f   :  { %571 = vmatprep.subr.bf16.mxu0 %v798_v2 }
  0x62   :  { %572 = vmatpush1.bf16.msra.mxu0 %v796_v3 }
  0x63   :  { %573 = vmatprep.subr.bf16.mxu0 %v801_v4 }
  0x66   :  { %574 = vmatpush1.bf16.msra.mxu0 %v799_v5 }
 0x11c   :  { %v703_v29 = vpop.f32.mrb[0].mxu0 }
 0x11d   :  { %v704_v31 = vpop.f32.mrb[1].mxu0 }
 0x11e   :  { %v705_v32 = vadd.f32 %v704_v31, %v703_v29  ;;  %v706_v33 = vpop.f32.mrb[2].mxu0 }
 0x11f   :  { %v707_v34 = vpop.f32.mrb[3].mxu0 }
 0x120   :  { %v232_v35 = vadd.f32 %v705_v32, %v642_v30 }
 0x122   :  { %v237_v36 = vmax.f32 %v232_v35, 0.0 }
 0x124   :  { %v238_v37 = vpack.c.bf16 %v237_v36, %v237_v36 }
 0x126   :  { %735 = vmatmul.mubr.bf16.vlgmr.msra.gmra.mrb[0].mxu1 %v238_v37 }
 0x1f9   :  { %v341_v39 = vpop.f32.mrb[0].mxu1 }
 0x1fa   :  { %v342_v40 = vadd.f32 %v659_v38, %v341_v39  ;;  %v736_v41 = vpop.f32.mrb[1].mxu1 }
 0x1fb   :  { %v344_v42 = vpop.f32.mrb[2].mxu1 }
 0x1fc   :  { %v381_v43 = vmul.f32 0.5, %v342_v40  ;;  %v737_v44 = vpop.f32.mrb[3].mxu1 }
 0x1fe   :  { %v382_v45 = vmul.f32 1.442695, %v381_v43 }
 0x200   :  { %802 = vpow2.f32 %v382_v45 }
 0x20a   :  { %v803_v46 = vpop.eup %802 }
 0x20b   :  { %418 = vrot.lane.b32.xlu0 %v803_v46, %s912_s3 }
 0x229   :  { %385 = vxpose.xlu0.b32.start.end [1/1] (short) (narrow) %v384_v47, 8 }
 0x252   :  { %753 = vset.pattern.permute.xlu0 %v914_v49 }
 0x27d   :  { %v419_v60 = vpop.permute.xlu0 %418 }
 0x2a9   :  { %v401_v61 = vpop.trf.xlu0 }
 0x2aa   :  { %v421_v62 = vmul.f32 %v419_v60, %v401_v61 }
 0x2ac   :  { %v422_v63 = vadd.f32 %v421_v62, %v342_v40 }
 0x2ae   :  { %427 = vperm.xlu1 %751, %v422_v63  }
 0x2b2   :  { %752 = vset.pattern.permute.xlu1 %v914_v49 }
 0x2b3   :  { %441 = vperm.xlu1 %752, %v422_v63  }
 0x2dc   :  { %347 = vxpose.xlu1.b32.start.end [1/1] (short) (narrow) %v342_v40, 8 }
 0x32d   :  { %v428_v13 = vpop.permute.xlu1 %427 }
 0x32e   :  { %v434_v14 = vmul.f32 %v433_v11, %v428_v13 }
 0x330   :  { %v439_v18 = vadd.f32 %v668_v16, %v434_v14 }
 0x332   :  { %v442_v17 = vpop.permute.xlu1 %441 }
 0x333   :  { %v448_v19 = vmul.f32 %v447_v15, %v442_v17 }
 0x335   :  { %v449_v20 = vadd.f32 %v448_v19, %v439_v18 }
 0x337   :  { %v450_v21 = vmax.f32 %v449_v20, 0.0 }
 0x339   :  { %v451_v22 = vpack.c.bf16 %v450_v21, %v450_v21 }
 0x33b   :  { %592 = vmatmul.mubr.bf16.vlgmr.msra.gmra.mrb[4].mxu0 %v451_v22 }
 0x35c   :  { %v363_v23 = vpop.trf.xlu1 }
 0x35d   :  { %380 = vst.msk [vmem:[#allocation8] sm:$0xf] %vm379_vm1, %v363_v23 }
 0x35e   :  { %863 = shalt.err (!%p860_p6)
}
 0x35f   :  { %s864_s10 = scalar_lea.hbm %s1066_s7, 64 }
 0x360   :  { %p865_p7 = scmp.ne.s32.totalorder %s1066_s7, %s864_s10  ;;  %p868_p8 = scmp.lt.u32.totalorder %s864_s10, %s1066_s7 }
 0x362   :  { %p870_p9 = pnand %p868_p8, %p865_p7 }
 0x364   :  { %873 = shalt.err (!%p870_p9)
}
 0x365   :  { %630 = dma.vmem_to_hbm [thread:$0]  %s628_s29, 64, %s1066_s7, [#allocation9]   ;;  %v641_v24 = vld [vmem:[%s1064_s5 + $0x3] ss:$4 sm:$0x3] }
 0x366   :  { %v472_v25 = vrot.slane %v641_v24, %v432_v10  ;;  %v476_v26 = vrot.slane %v641_v24, %v446_v12  ;;  %s916_s18 = smov [#allocation7]  }
 0x367   :  { %s617_s19 = sshll.u32 %s916_s18, 4  ;;  %s618_s19 = int_to_ptr.vmem [resolvable:$true] %s617_s19 }
 0x368   :  { %s874_s7 = scalar_lea.vmem %s618_s19, 128  ;;  %p879_p11 = scmp.lt.s32.totalorder %s618_s19, %s618_s19 }
 0x369   :  { %p875_p10 = scmp.ne.s32.totalorder %s618_s19, %s874_s7  ;;  %p880_p12 = scmp.lt.s32.totalorder %s874_s7, %s874_s7 }
 0x36b   :  { %p881_p13 = por %p880_p12, %p879_p11 }
 0x36d   :  { %p882_p0 = pnand %p881_p13, %p875_p10 }
 0x40e   :  { %v593_v27 = vpop.f32.mrb[4].mxu0 }
 0x40f   :  { %v594_v28 = vadd.f32 %v593_v27, %v472_v25  ;;  %v595_v29 = vpop.f32.mrb[5].mxu0 }
 0x410   :  { %v596_v30 = vadd.f32 %v595_v29, %v476_v26  ;;  %v597_v31 = vpop.f32.mrb[6].mxu0 }
 0x411   :  { %804 = vtanh.f32 %v594_v28  ;;  %v598_v32 = vpop.f32.mrb[7].mxu0 }
 0x412   :  { %806 = vtanh.f32 %v596_v30 }
 0x41b   :  { %v805_v33 = vpop.eup %804 }
 0x41c   :  { %v807_v34 = vpop.eup %806 }
 0x41d   :  { %v686_v35 = vpack.c.bf16 %v807_v34, %v805_v33 }
 0x41f   :  { %610 = vst [vmem:[#allocation7] sm:$0xff] %v686_v35 }
 0x420   :  { %885 = shalt.err (!%p882_p0)
}
 0x421   :  { %s886_s21 = scalar_lea.hbm %s1065_s6, 128 }
 0x422   :  { %p887_p1 = scmp.ne.s32.totalorder %s1065_s6, %s886_s21  ;;  %p890_p2 = scmp.lt.u32.totalorder %s886_s21, %s1065_s6 }
 0x424   :  { %p892_p3 = pnand %p890_p2, %p887_p1 }
 0x426   :  { %895 = shalt.err (!%p892_p3)
}
 0x427   :  { %620 = dma.vmem_to_hbm [thread:$0]  %s618_s19, 128, %s1065_s6, [#allocation4]  }
 0x428   :  { %900 = dma.done.wait [#allocation4], 128  }
 0x429   :  { %901 = vsyncadd [#allocation4], 4294967168 }
 0x42a   :  { %902 = dma.done.wait [#allocation9], 64  }
 0x42b   :  { %903 = vsyncadd [#allocation9], 4294967232 }
 0x42c   :  { %637 = vsyncpa [#allocation3], 1 }
 0x42d   :  { %638 = vsyncpa [#allocation6], 1 }
 0x42e   :  { %639 = vsyncpa [#allocation4], 1 }
 0x42f   :  { %640 = vsyncpa [#allocation9], 1 }

</bundles_post_ra>
